<compile_context>
chip_gen: v7x
topology: tpu7x:2x2x1
jax: 0.10.0
libtpu: 0.0.40
codegen_flags: <defaults>
</compile_context>

<pallas_src>
import functools

import jax
import jax.numpy as jnp
from jax.experimental import pallas as pl
from jax.experimental.pallas import tpu as pltpu


def _ghost_conv_kernel(x_ref, w1_ref, b1_ref, w2_ref, b2_ref, o_ref, *, H, W):
    # x_ref  : (1, Cin, S)      one batch element, S = H*W on the lane axis
    # w1_ref : (Chid, 9*Cin)    folded primary 3x3 conv weight (BN1 folded)
    # b1_ref : (Chid, 1)        folded BN1 bias
    # w2_ref : (Cg, Chid)       folded ghost 1x1 conv weight (BN2 folded)
    # b2_ref : (Cg, 1)          folded BN2 bias
    # o_ref  : (1, Cout, S)     Cout = Chid + Cg, [primary ; ghost]
    Cin = x_ref.shape[1]
    S = x_ref.shape[2]

    x = x_ref[0].astype(jnp.float32)                       # (Cin, S)

    # Spatial coordinates along the lane axis (no integer division needed).
    pos = jax.lax.broadcasted_iota(jnp.int32, (1, S), 1)   # flat index p
    if W & (W - 1) == 0:
        w_idx = jnp.bitwise_and(pos, W - 1)                # p % W (W pow2)
    else:
        w_idx = jax.lax.rem(pos, W)

    # Build the 9 shifted taps of the 3x3 conv as lane rolls + boundary masks.
    # tap_{kh,kw}[c, p] = x[c, p + d] (zero outside the image), d = dh*W + dw.
    taps = []
    for kh in range(3):
        dh = kh - 1
        if dh < 0:
            hmask = pos >= W                               # h >= 1
        elif dh > 0:
            hmask = pos < (H - 1) * W                      # h <= H-2
        else:
            hmask = None
        for kw in range(3):
            dw = kw - 1
            if dw < 0:
                wmask = w_idx >= 1                         # w >= 1
            elif dw > 0:
                wmask = w_idx < (W - 1)                    # w <= W-2
            else:
                wmask = None
            d = dh * W + dw
            shifted = x if d == 0 else pltpu.roll(x, (-d) % S, 1)
            if hmask is None:
                mask = wmask
            elif wmask is None:
                mask = hmask
            else:
                mask = jnp.logical_and(hmask, wmask)
            if mask is not None:
                shifted = jnp.where(mask, shifted, 0.0)
            taps.append(shifted)
    stacked = jnp.concatenate(taps, axis=0)                # (9*Cin, S)

    # Primary 3x3 conv + BN1 + ReLU as one MXU matmul, lane-dense output.
    h1 = jnp.dot(w1_ref[...], stacked, preferred_element_type=jnp.float32)
    h1 = jnp.maximum(h1 + b1_ref[...], 0.0)                # (Chid, S)

    # Ghost 1x1 conv + BN2 + ReLU.
    h2 = jnp.dot(w2_ref[...], h1, preferred_element_type=jnp.float32)
    h2 = jnp.maximum(h2 + b2_ref[...], 0.0)                # (Cg, S)

    # torch.cat([primary, ghost], dim=1): single lane-dense store.
    o_ref[0] = jnp.concatenate([h1, h2], axis=0).astype(o_ref.dtype)


def ghost_conv(x_nchw, params):
    """x_nchw: (B, Cin, H, W) float32. Returns (B, Cout, H, W)."""
    B, Cin, H, W = x_nchw.shape
    w1_flat, b1, w2, b2 = params
    Chid = w1_flat.shape[0]
    Cg = w2.shape[0]
    Cout = Chid + Cg
    S = H * W
    assert w1_flat.shape[1] == 9 * Cin

    x_flat = x_nchw.reshape(B, Cin, S)                     # free reshape

    kernel = functools.partial(_ghost_conv_kernel, H=H, W=W)

    out = pl.pallas_call(
        kernel,
        out_shape=jax.ShapeDtypeStruct((B, Cout, S), x_nchw.dtype),
        grid_spec=pltpu.PrefetchScalarGridSpec(
            num_scalar_prefetch=0,
            grid=(B,),
            in_specs=[
                pl.BlockSpec((1, Cin, S), lambda b: (b, 0, 0)),
                pl.BlockSpec((Chid, 9 * Cin), lambda b: (0, 0)),
                pl.BlockSpec((Chid, 1), lambda b: (0, 0)),
                pl.BlockSpec((Cg, Chid), lambda b: (0, 0)),
                pl.BlockSpec((Cg, 1), lambda b: (0, 0)),
            ],
            out_specs=pl.BlockSpec((1, Cout, S), lambda b: (b, 0, 0)),
        ),
        # Batch axis is parallel -> v7x can shard it across its 2 TensorCores.
        compiler_params=pltpu.CompilerParams(
            dimension_semantics=("parallel",)),
    )(x_flat, w1_flat, b1, w2, b2)

    return out.reshape(B, Cout, H, W)


def make_params(key, in_channels, out_channels, ratio=2, eps=1e-5):
    """Deterministic parameters; inference-mode BN folded into the convs."""
    hidden = out_channels // ratio
    ghost = out_channels - hidden
    ks = jax.random.split(key, 10)

    conv1_w = jax.random.normal(
        ks[0], (hidden, in_channels, 3, 3), jnp.float32) * 0.1      # OIHW
    conv2_w = jax.random.normal(
        ks[1], (ghost, hidden), jnp.float32) * 0.1                  # OI (1x1)

    def bn(kg, kb, km, kv, c):
        gamma = 1.0 + 0.1 * jax.random.normal(kg, (c,), jnp.float32)
        beta = 0.1 * jax.random.normal(kb, (c,), jnp.float32)
        mean = 0.1 * jax.random.normal(km, (c,), jnp.float32)
        var = jax.nn.softplus(jax.random.normal(kv, (c,), jnp.float32)) + 0.5
        return gamma, beta, mean, var

    bn1 = bn(ks[2], ks[3], ks[4], ks[5], hidden)
    bn2 = bn(ks[6], ks[7], ks[8], ks[9], ghost)

    s1 = bn1[0] / jnp.sqrt(bn1[3] + eps)
    s2 = bn2[0] / jnp.sqrt(bn2[3] + eps)

    # Fold BN scale into weights; BN shift becomes a per-channel bias.
    w1_folded = conv1_w * s1[:, None, None, None]          # (Chid, Cin, 3, 3)
    # Reorder to match the kernel's tap stacking order (kh, kw, ci):
    w1_flat = jnp.transpose(w1_folded, (0, 2, 3, 1)).reshape(
        hidden, 9 * in_channels)                           # (Chid, 9*Cin)
    b1 = (bn1[1] - bn1[2] * s1)[:, None]                   # (Chid, 1)

    w2_folded = conv2_w * s2[:, None]                      # (Cg, Chid)
    b2 = (bn2[1] - bn2[2] * s2)[:, None]                   # (Cg, 1)

    raw = (conv1_w, conv2_w, bn1, bn2)
    return (w1_flat, b1, w2_folded, b2), raw


def reference_ghostconv_nchw(x, raw, eps=1e-5):
    """Pure-JAX NCHW reference mirroring the PyTorch forward (eval-mode BN)."""
    conv1_w, conv2_w, bn1, bn2 = raw
    Chid = conv1_w.shape[0]
    Cg = conv2_w.shape[0]

    def bn_apply(y, p):
        g, b, m, v = p
        inv = 1.0 / jnp.sqrt(v + eps)
        return (y - m[None, :, None, None]) * inv[None, :, None, None] \
            * g[None, :, None, None] + b[None, :, None, None]

    dn1 = jax.lax.conv_dimension_numbers(x.shape, conv1_w.shape,
                                         ("NCHW", "OIHW", "NCHW"))
    primary = jax.lax.conv_general_dilated(
        x, conv1_w, (1, 1), ((1, 1), (1, 1)), dimension_numbers=dn1)
    primary = jax.nn.relu(bn_apply(primary, bn1))

    w2_4d = conv2_w[:, :, None, None]                      # (Cg, Chid, 1, 1)
    dn2 = jax.lax.conv_dimension_numbers(primary.shape, w2_4d.shape,
                                         ("NCHW", "OIHW", "NCHW"))
    ghost = jax.lax.conv_general_dilated(
        primary, w2_4d, (1, 1), "VALID", dimension_numbers=dn2)
    ghost = jax.nn.relu(bn_apply(ghost, bn2))

    return jnp.concatenate([primary, ghost], axis=1)


if __name__ == "__main__":
    B, Cin, H, W = 2, 4, 16, 16
    Cout, ratio = 8, 2

    key = jax.random.PRNGKey(0)
    kx, kp = jax.random.split(key)
    x = jax.random.normal(kx, (B, Cin, H, W), jnp.float32)

    params, raw = make_params(kp, Cin, Cout, ratio=ratio)

    out = jax.block_until_ready(ghost_conv(x, params))
    ref = jax.block_until_ready(reference_ghostconv_nchw(x, raw))

    assert out.shape == (B, Cout, H, W)
    err = jnp.max(jnp.abs(out - ref))
    assert jnp.allclose(out, ref, atol=1e-4, rtol=1e-4), f"max err {err}"

    print("KERNEL_OK")
</pallas_src>

<mosaic_0001>
module attributes {stable_mosaic.version = 11 : i64} {
  func.func @_ghost_conv_kernel(%arg0: i32, %arg1: memref<1x4x256xf32, #tpu.memory_space<vmem>>, %arg2: memref<4x36xf32, #tpu.memory_space<vmem>>, %arg3: memref<4x1xf32, #tpu.memory_space<vmem>>, %arg4: memref<4x4xf32, #tpu.memory_space<vmem>>, %arg5: memref<4x1xf32, #tpu.memory_space<vmem>>, %arg6: memref<1x8x256xf32, #tpu.memory_space<vmem>>) attributes {dimension_semantics = [#tpu.dimension_semantics<parallel>], iteration_bounds = array<i64: 2>, scalar_prefetch = 0 : i64, scratch_operands = 0 : i64, tpu.core_type = #tpu.core_type<tc>, window_params = [{transform_indices = @transform_0, window_bounds = array<i64: 1, 4, 256>}, {pipeline_mode = #tpu.pipeline_mode<synchronous>, transform_indices = @transform_1, window_bounds = array<i64: 4, 36>}, {pipeline_mode = #tpu.pipeline_mode<synchronous>, transform_indices = @transform_2, window_bounds = array<i64: 4, 1>}, {pipeline_mode = #tpu.pipeline_mode<synchronous>, transform_indices = @transform_3, window_bounds = array<i64: 4, 4>}, {pipeline_mode = #tpu.pipeline_mode<synchronous>, transform_indices = @transform_4, window_bounds = array<i64: 4, 1>}, {transform_indices = @transform_5, window_bounds = array<i64: 1, 8, 256>}]} {
    %c0 = arith.constant 0 : index
    %c0_0 = arith.constant 0 : index
    %c0_1 = arith.constant 0 : index
    %0 = vector.load %arg1[%c0, %c0_0, %c0_1] : memref<1x4x256xf32, #tpu.memory_space<vmem>>, vector<1x4x256xf32>
    %1 = vector.shape_cast %0 : vector<1x4x256xf32> to vector<4x256xf32>
    %2 = tpu.iota {dimensions = array<i32: 1>} : vector<1x256xi32>
    %c15_i32 = arith.constant 15 : i32
    %3 = vector.broadcast %c15_i32 : i32 to vector<1x256xi32>
    %4 = arith.andi %2, %3 : vector<1x256xi32>
    %c16_i32 = arith.constant 16 : i32
    %5 = vector.broadcast %c16_i32 : i32 to vector<1x256xi32>
    %6 = arith.cmpi sge, %2, %5 : vector<1x256xi32>
    %c1_i32 = arith.constant 1 : i32
    %7 = vector.broadcast %c1_i32 : i32 to vector<1x256xi32>
    %8 = arith.cmpi sge, %4, %7 : vector<1x256xi32>
    %c17_i32 = arith.constant 17 : i32
    %9 = tpu.dynamic_rotate %1 by %c17_i32 dim 1 : vector<4x256xf32>, i32 -> vector<4x256xf32>
    %10 = arith.andi %6, %8 : vector<1x256xi1>
    %cst = arith.constant 0.000000e+00 : f32
    %11 = vector.shape_cast %10 : vector<1x256xi1> to vector<1x256xi1>
    %12 = vector.broadcast %11 : vector<1x256xi1> to vector<4x256xi1>
    %13 = vector.broadcast %cst : f32 to vector<4x256xf32>
    %14 = arith.select %12, %9, %13 : vector<4x256xi1>, vector<4x256xf32>
    %c16_i32_2 = arith.constant 16 : i32
    %15 = tpu.dynamic_rotate %1 by %c16_i32_2 dim 1 : vector<4x256xf32>, i32 -> vector<4x256xf32>
    %cst_3 = arith.constant 0.000000e+00 : f32
    %16 = vector.shape_cast %6 : vector<1x256xi1> to vector<1x256xi1>
    %17 = vector.broadcast %16 : vector<1x256xi1> to vector<4x256xi1>
    %18 = vector.broadcast %cst_3 : f32 to vector<4x256xf32>
    %19 = arith.select %17, %15, %18 : vector<4x256xi1>, vector<4x256xf32>
    %c15_i32_4 = arith.constant 15 : i32
    %20 = vector.broadcast %c15_i32_4 : i32 to vector<1x256xi32>
    %21 = arith.cmpi slt, %4, %20 : vector<1x256xi32>
    %c15_i32_5 = arith.constant 15 : i32
    %22 = tpu.dynamic_rotate %1 by %c15_i32_5 dim 1 : vector<4x256xf32>, i32 -> vector<4x256xf32>
    %23 = arith.andi %6, %21 : vector<1x256xi1>
    %cst_6 = arith.constant 0.000000e+00 : f32
    %24 = vector.shape_cast %23 : vector<1x256xi1> to vector<1x256xi1>
    %25 = vector.broadcast %24 : vector<1x256xi1> to vector<4x256xi1>
    %26 = vector.broadcast %cst_6 : f32 to vector<4x256xf32>
    %27 = arith.select %25, %22, %26 : vector<4x256xi1>, vector<4x256xf32>
    %c1_i32_7 = arith.constant 1 : i32
    %28 = vector.broadcast %c1_i32_7 : i32 to vector<1x256xi32>
    %29 = arith.cmpi sge, %4, %28 : vector<1x256xi32>
    %c1_i32_8 = arith.constant 1 : i32
    %30 = tpu.dynamic_rotate %1 by %c1_i32_8 dim 1 : vector<4x256xf32>, i32 -> vector<4x256xf32>
    %cst_9 = arith.constant 0.000000e+00 : f32
    %31 = vector.shape_cast %29 : vector<1x256xi1> to vector<1x256xi1>
    %32 = vector.broadcast %31 : vector<1x256xi1> to vector<4x256xi1>
    %33 = vector.broadcast %cst_9 : f32 to vector<4x256xf32>
    %34 = arith.select %32, %30, %33 : vector<4x256xi1>, vector<4x256xf32>
    %c15_i32_10 = arith.constant 15 : i32
    %35 = vector.broadcast %c15_i32_10 : i32 to vector<1x256xi32>
    %36 = arith.cmpi slt, %4, %35 : vector<1x256xi32>
    %c255_i32 = arith.constant 255 : i32
    %37 = tpu.dynamic_rotate %1 by %c255_i32 dim 1 : vector<4x256xf32>, i32 -> vector<4x256xf32>
    %cst_11 = arith.constant 0.000000e+00 : f32
    %38 = vector.shape_cast %36 : vector<1x256xi1> to vector<1x256xi1>
    %39 = vector.broadcast %38 : vector<1x256xi1> to vector<4x256xi1>
    %40 = vector.broadcast %cst_11 : f32 to vector<4x256xf32>
    %41 = arith.select %39, %37, %40 : vector<4x256xi1>, vector<4x256xf32>
    %c240_i32 = arith.constant 240 : i32
    %42 = vector.broadcast %c240_i32 : i32 to vector<1x256xi32>
    %43 = arith.cmpi slt, %2, %42 : vector<1x256xi32>
    %c1_i32_12 = arith.constant 1 : i32
    %44 = vector.broadcast %c1_i32_12 : i32 to vector<1x256xi32>
    %45 = arith.cmpi sge, %4, %44 : vector<1x256xi32>
    %c241_i32 = arith.constant 241 : i32
    %46 = tpu.dynamic_rotate %1 by %c241_i32 dim 1 : vector<4x256xf32>, i32 -> vector<4x256xf32>
    %47 = arith.andi %43, %45 : vector<1x256xi1>
    %cst_13 = arith.constant 0.000000e+00 : f32
    %48 = vector.shape_cast %47 : vector<1x256xi1> to vector<1x256xi1>
    %49 = vector.broadcast %48 : vector<1x256xi1> to vector<4x256xi1>
    %50 = vector.broadcast %cst_13 : f32 to vector<4x256xf32>
    %51 = arith.select %49, %46, %50 : vector<4x256xi1>, vector<4x256xf32>
    %c240_i32_14 = arith.constant 240 : i32
    %52 = tpu.dynamic_rotate %1 by %c240_i32_14 dim 1 : vector<4x256xf32>, i32 -> vector<4x256xf32>
    %cst_15 = arith.constant 0.000000e+00 : f32
    %53 = vector.shape_cast %43 : vector<1x256xi1> to vector<1x256xi1>
    %54 = vector.broadcast %53 : vector<1x256xi1> to vector<4x256xi1>
    %55 = vector.broadcast %cst_15 : f32 to vector<4x256xf32>
    %56 = arith.select %54, %52, %55 : vector<4x256xi1>, vector<4x256xf32>
    %c15_i32_16 = arith.constant 15 : i32
    %57 = vector.broadcast %c15_i32_16 : i32 to vector<1x256xi32>
    %58 = arith.cmpi slt, %4, %57 : vector<1x256xi32>
    %c239_i32 = arith.constant 239 : i32
    %59 = tpu.dynamic_rotate %1 by %c239_i32 dim 1 : vector<4x256xf32>, i32 -> vector<4x256xf32>
    %60 = arith.andi %43, %58 : vector<1x256xi1>
    %cst_17 = arith.constant 0.000000e+00 : f32
    %61 = vector.shape_cast %60 : vector<1x256xi1> to vector<1x256xi1>
    %62 = vector.broadcast %61 : vector<1x256xi1> to vector<4x256xi1>
    %63 = vector.broadcast %cst_17 : f32 to vector<4x256xf32>
    %64 = arith.select %62, %59, %63 : vector<4x256xi1>, vector<4x256xf32>
    %65 = tpu.concatenate %14, %19, %27, %34, %1, %41, %51, %56, %64 in 0 : vector<4x256xf32>, vector<4x256xf32>, vector<4x256xf32>, vector<4x256xf32>, vector<4x256xf32>, vector<4x256xf32>, vector<4x256xf32>, vector<4x256xf32>, vector<4x256xf32> -> vector<36x256xf32>
    %c0_18 = arith.constant 0 : index
    %c0_19 = arith.constant 0 : index
    %66 = vector.load %arg2[%c0_18, %c0_19] : memref<4x36xf32, #tpu.memory_space<vmem>>, vector<4x36xf32>
    %cst_20 = arith.constant dense<0.000000e+00> : vector<4x256xf32>
    %67 = tpu.matmul %66, %65, %cst_20 {dimension_numbers = #tpu.dot_dimension_numbers<[1], [0], [0], [1], [0, 0, 1, 1], [], []>} : vector<4x36xf32>, vector<36x256xf32>, vector<4x256xf32> -> vector<4x256xf32>
    %c0_21 = arith.constant 0 : index
    %c0_22 = arith.constant 0 : index
    %68 = vector.load %arg3[%c0_21, %c0_22] : memref<4x1xf32, #tpu.memory_space<vmem>>, vector<4x1xf32>
    %69 = vector.broadcast %68 : vector<4x1xf32> to vector<4x256xf32>
    %70 = arith.addf %67, %69 : vector<4x256xf32>
    %cst_23 = arith.constant 0.000000e+00 : f32
    %71 = vector.broadcast %cst_23 : f32 to vector<4x256xf32>
    %72 = arith.maximumf %70, %71 : vector<4x256xf32>
    %c0_24 = arith.constant 0 : index
    %c0_25 = arith.constant 0 : index
    %73 = vector.load %arg4[%c0_24, %c0_25] : memref<4x4xf32, #tpu.memory_space<vmem>>, vector<4x4xf32>
    %cst_26 = arith.constant dense<0.000000e+00> : vector<4x256xf32>
    %74 = tpu.matmul %73, %72, %cst_26 {dimension_numbers = #tpu.dot_dimension_numbers<[1], [0], [0], [1], [0, 0, 1, 1], [], []>} : vector<4x4xf32>, vector<4x256xf32>, vector<4x256xf32> -> vector<4x256xf32>
    %c0_27 = arith.constant 0 : index
    %c0_28 = arith.constant 0 : index
    %75 = vector.load %arg5[%c0_27, %c0_28] : memref<4x1xf32, #tpu.memory_space<vmem>>, vector<4x1xf32>
    %76 = vector.broadcast %75 : vector<4x1xf32> to vector<4x256xf32>
    %77 = arith.addf %74, %76 : vector<4x256xf32>
    %cst_29 = arith.constant 0.000000e+00 : f32
    %78 = vector.broadcast %cst_29 : f32 to vector<4x256xf32>
    %79 = arith.maximumf %77, %78 : vector<4x256xf32>
    %80 = tpu.concatenate %72, %79 in 0 : vector<4x256xf32>, vector<4x256xf32> -> vector<8x256xf32>
    %c0_30 = arith.constant 0 : index
    %c0_31 = arith.constant 0 : index
    %c0_32 = arith.constant 0 : index
    %81 = vector.load %arg6[%c0_30, %c0_31, %c0_32] : memref<1x8x256xf32, #tpu.memory_space<vmem>>, vector<1x8x256xf32>
    %82 = vector.shape_cast %81 : vector<1x8x256xf32> to vector<8x256xf32>
    %83 = vector.shape_cast %80 : vector<8x256xf32> to vector<1x8x256xf32>
    tpu.vector_store %arg6[%c0_30, %c0_31, %c0_32], %83 {strides = array<i32>} : memref<1x8x256xf32, #tpu.memory_space<vmem>>, vector<1x8x256xf32>,
    return
  }
  func.func @transform_0(%arg0: i32) -> (i32, i32, i32) {
    %c0_i32 = arith.constant 0 : i32
    %c0_i32_0 = arith.constant 0 : i32
    %c0_i32_1 = arith.constant 0 : i32
    return %arg0, %c0_i32, %c0_i32_0 : i32, i32, i32
  }
  func.func @transform_1(%arg0: i32) -> (i32, i32) {
    %c0_i32 = arith.constant 0 : i32
    %c0_i32_0 = arith.constant 0 : i32
    %c0_i32_1 = arith.constant 0 : i32
    return %c0_i32, %c0_i32_0 : i32, i32
  }
  func.func @transform_2(%arg0: i32) -> (i32, i32) {
    %c0_i32 = arith.constant 0 : i32
    %c0_i32_0 = arith.constant 0 : i32
    %c0_i32_1 = arith.constant 0 : i32
    return %c0_i32, %c0_i32_0 : i32, i32
  }
  func.func @transform_3(%arg0: i32) -> (i32, i32) {
    %c0_i32 = arith.constant 0 : i32
    %c0_i32_0 = arith.constant 0 : i32
    %c0_i32_1 = arith.constant 0 : i32
    return %c0_i32, %c0_i32_0 : i32, i32
  }
  func.func @transform_4(%arg0: i32) -> (i32, i32) {
    %c0_i32 = arith.constant 0 : i32
    %c0_i32_0 = arith.constant 0 : i32
    %c0_i32_1 = arith.constant 0 : i32
    return %c0_i32, %c0_i32_0 : i32, i32
  }
  func.func @transform_5(%arg0: i32) -> (i32, i32, i32) {
    %c0_i32 = arith.constant 0 : i32
    %c0_i32_0 = arith.constant 0 : i32
    %c0_i32_1 = arith.constant 0 : i32
    return %arg0, %c0_i32, %c0_i32_0 : i32, i32, i32
  }
}

</mosaic_0001>

<bundles_post_ra>
// kernel: tpu_custom_call.1
= control target key start
LH: loop header
LB: loop body
LE: loop exit
PB: predicated region body
PF: predicated region fallthrough
CT: control target
= control target key end

     0   :  { %10 = vsyncpa [#allocation3], 0  ;;  %s1267_s0 = inlined_call_operand.hbm [shape: f32[2,4,256], index: 0, kind: input, shape index: {}]   ;;  %s1268_s1 = inlined_call_operand.vmem [shape: f32[4,36], index: 1, kind: input, shape index: {}]   ;;  %s1269_s2 = inlined_call_operand.vmem [shape: f32[4,1], index: 2, kind: input, shape index: {}]   ;;  %s1270_s3 = inlined_call_operand.vmem [shape: f32[4,4], index: 3, kind: input, shape index: {}]   ;;  %s1271_s4 = inlined_call_operand.vmem [shape: f32[4,1], index: 4, kind: input, shape index: {}]   ;;  %s1272_s5 = inlined_call_operand.hbm [shape: f32[2,8,256], index: 5, kind: output, shape index: {}]  }
   0x1   :  { %12 = vsyncpa [#allocation3 + $0x1], 0 }
   0x2   :  { %13 = vsyncpa [#allocation4], 0 }
   0x3   :  { %15 = vsyncpa [#allocation4 + $0x1], 0  ;;  %s942_s18 = smov 0   ;;  %s944_s19 = smov 0  }
   0x4   :  { %s946_s20 = smov 0   ;;  %s948_s21 = smov 0  }
   0x5 LB: > { %s963_s22 = sadd.s32 4294967295, %s898_s21   ;;  %s678_s23 = sadd.s32 4294967294, %s898_s21   ;;  %s898_s21 = sphi %s948_s21, %s1303_s21   ;;  %s894_s20 = sphi %s946_s20, %s1302_s20   ;;  %s890_s19 = sphi %s944_s19, %s1301_s19   ;;  %s886_s18 = sphi %s942_s18, %s1300_s18  }
   0x6   : > { %s967_s24 = sadd.s32 1, %s898_s21   ;;  %s28_s25 = sadd.s32 1, %s894_s20 }
   0x7   : > { %s25_s26 = ssub.s32 %s898_s21, %s967_s24  ;;  %p35_p0 = scmp.ne.s32.totalorder %s894_s20, %s890_s19 }
   0x8   : > { %p26_p1 = scmp.eq.s32.totalorder %s25_s26, 0  ;;  %p36_p2 = scmp.eq.s32.totalorder %s898_s21, 0 }
   0x9   : > { %p41_p3 = scmp.ne.s32.totalorder %s890_s19, %s886_s18  ;;  %p42_p4 = scmp.eq.s32.totalorder %s963_s22, 0 }
   0xa   : > { %s979_s27 = scalar_select %p26_p1, %s894_s20, %s28_s25  }
   0xb   : > { %p981_p5 = por %p36_p2, %p35_p0  ;;  %p985_p6 = por %p42_p4, %p41_p3 }
   0xc   : > { %p149_p7 = scmp.eq.s32.totalorder %s963_s22, 1  ;;  %p155_p8 = scmp.eq.s32.totalorder %s678_s23, 1 }
   0xd   : > { %p720_p10 = scmp.lt.s32.totalorder %s898_s21, 2  ;;  %s187_s7 = sand.u32 1, %s894_s20  }
   0xe   : > { %p992_p11 = por %p149_p7, %p35_p0  ;;  %p996_p12 = por %p155_p8, %p41_p3 }
   0xf   : > { %s698_s8 = sshll.u32 %s898_s21, 7  ;;  %s681_s9 = sshll.u32 %s187_s7, 3 }
  0x10   : > { %s1276_s30 = scalar_select %p992_p11, 1, 0 }
  0x11   : > { %s1277_s6 = scalar_select %p996_p12, 1, 0 }
  0x12   : > { %s1005_s12 = scalar_lea.hbm %s1267_s0, %s698_s8  ;;  %s191_s13 = scalar_lea.vmem [#allocation2], %s681_s9 }
  0x13   : > { %s199_s14 = sshll.u32 %s191_s13, 4  ;;  %p1009_p13 = pnand %p720_p10, %p981_p5  ;;  %s1013_s14 = int_to_ptr.vmem [resolvable:$true] %s199_s14 }
  0x14   : > { %s188_s16 = scalar_lea.sflag [#allocation3], %s187_s7  ;;  %s802_s17 = scalar_lea.hbm %s1005_s12, 128 }
  0x15   : > { %p803_p2 = scmp.ne.s32.totalorder %s1005_s12, %s802_s17  ;;  %p804_p3 = pneg %p1009_p13 }
  0x16   : > { %s807_s26 = scalar_lea.hbm %s1267_s0, 256  ;;  %p808_p5 = scmp.lt.u32.totalorder %s1005_s12, %s1267_s0 }
  0x17   : > { %p805_p4 = pnand %p804_p3, %p803_p2  ;;  %p809_p8 = scmp.lt.u32.totalorder %s807_s26, %s802_s17 }
  0x18   : > { %p811_p9 = scmp.lt.u32.totalorder %s802_s17, %s1005_s12 }
  0x19   : > { %p806_p7 = pneg %p805_p4  ;;  %p810_p10 = por %p809_p8, %p808_p5 }
  0x1b   : > { %p812_p0 = por %p811_p9, %p810_p10 }
  0x1d   : > { %p813_p1 = pnand %p812_p0, %p806_p7 }
  0x1f   : > { %816 = shalt.err (!%p813_p1)
}
  0x20   : > { %s817_s7 = scalar_lea.vmem %s1013_s14, 128  ;;  %s900_s9 = smov [#allocation2]  }
  0x21   : > { %p818_p2 = scmp.ne.s32.totalorder %s1013_s14, %s817_s7  ;;  %s822_s10 = sshll.u32 %s900_s9, 4  ;;  %s823_s10 = int_to_ptr.vmem [resolvable:$false] %s822_s10 }
  0x22   : > { %s824_s11 = scalar_lea.vmem %s823_s10, 256  ;;  %p825_p11 = scmp.lt.s32.totalorder %s1013_s14, %s823_s10 }
  0x23   : > { %p820_p4 = pnand %p818_p2, %p804_p3  ;;  %p826_p5 = scmp.lt.s32.totalorder %s824_s11, %s817_s7 }
  0x25   : > { %p821_p12 = pneg %p820_p4  ;;  %p827_p8 = por %p826_p5, %p825_p11 }
  0x27   : > { %p828_p9 = pnand %p827_p8, %p821_p12 }
  0x29   : > { %831 = shalt.err (!%p828_p9)
}
  0x2a   : > { %715 = dma.hbm_to_vmem [thread:$0]  (!%p1009_p13), %s1005_s12, 128, %s1013_s14, %s188_s16  }
  0x2b   : > { %p1279_p0 = scmp.lt.s32.totalorder %s898_s21, 3  ;;  %p1280_p1 = scmp.ge.s32.totalorder %s898_s21, 1 }
  0x2d   : > { %p205_p3 = pnand %p1280_p1, %p1279_p0 }
  0x2e   : > { %s1047_s13 = sand.u32 (!%p205_p3), 1, %s890_s19  }
  0x2f   : > { %208 = sbr.rel (%p205_p3) target bundleno = 653 (0x28d), region = 40  ;;  %s685_s17 = sshll.u32 (!%p205_p3), %s1047_s13, 3 }
  0x30   : > { %s211_s23 = scalar_lea.sflag (!%p205_p3), [#allocation3], %s1047_s13  ;;  %s214_s25 = scalar_lea.vmem (!%p205_p3), [#allocation2], %s685_s17 }
  0x36   : > { %877 = dma.done.wait (%p985_p6), %s211_s23, 128  }
  0x37   : > { %879 = vsyncadd (%p985_p6), %s211_s23, 4294967168  ;;  %v1055_v0 = vld [vmem:[%s214_s25] sm:$0xff]  ;;  %s901_s12 = smov 17   ;;  %s902_s14 = smov 1   ;;  %v909_v3 = vmov 0.0   ;;  %v910_v4 = vmov 0   ;;  %v242_v6 = vlaneseq }
  0x38   : > { %v1059_v1 = vcombine.high %v1055_v0, %v1055_v0  ;;  %s903_s15 = smov 15   ;;  %s904_s16 = smov 16   ;;  %484 = vmatprep.mubr.f32.mxu0 %v909_v3  ;;  %799 = vset.pattern.permute.xlu1 %v910_v4  ;;  %v404_v5 = vld [vmem:[%s1269_s2] sm:$0xf]  ;;  %vm394_vm11 = vcmask 1043456  }
  0x39   : > { %s905_s26 = smov 127   ;;  %s906_s29 = smov 112   ;;  %574 = vmatprep.mubr.f32.mxu1 %v909_v3  ;;  %800 = vset.pattern.permute.xlu0 %v910_v4  ;;  %v1068_v7 = vand.u32 127, %v242_v6 }
  0x3a   : > { %v774_v2 = vpack.i.bf16 %v1059_v1, %v1055_v0  ;;  %s907_s28 = smov 113   ;;  %s908_s8 = smov 111  }
  0x3b   : > { %v1071_v8 = vadd.s32 128, %v1068_v7  ;;  %v245_v9 = vand.u32 15, %v1068_v7  ;;  %vm303_vm0 = vcmp.lt.s32.totalorder %v1068_v7, 1  ;;  %vm273_vm1 = vcmp.lt.s32.totalorder %v1068_v7, 16  ;;  %p1297_p11 = scmp.ne.s32.totalorder %s1276_s30, 0  ;;  %s911_s9 = smov [#allocation5]  }
  0x3c   : > { %775 = vrot.lane.b32.xlu1 %v774_v2, %s901_s12  ;;  %765 = vrot.lane.b32.xlu0 %v774_v2, %s902_s14  ;;  %vm258_vm2 = vcmp.lt.s32.totalorder %v1068_v7, 17  ;;  %vm316_vm3 = vcmp.lt.s32.totalorder %v1068_v7, 127  ;;  %vm288_vm5 = vcmp.lt.s32.totalorder %v1068_v7, 15  ;;  %vm247_vm6 = vcmp.ge.s32.totalorder %v1068_v7, 16  ;;  %s686_s14 = sshll.u32 %s1047_s13, 4  ;;  %s836_s10 = sshll.u32 %s911_s9, 4  ;;  %s837_s10 = int_to_ptr.vmem [resolvable:$false] %s836_s10 }
  0x3d   : > { %v246_v10 = vand.u32 15, %v1071_v8  ;;  %vm1085_vm7 = vcmp.ge.s32.totalorder %v245_v9, 1  ;;  %vm1089_vm8 = vcmp.lt.s32.totalorder %v245_v9, 15  ;;  %vm326_vm9 = vcmp.lt.s32.totalorder %v1071_v8, 240  ;;  %s838_s11 = scalar_lea.vmem %s837_s10, 512 }
  0x3e   : > { %vm1110_vm12 = vmand %vm247_vm6, %vm1085_vm7  ;;  %vm346_vm13 = vcmp.lt.s32.totalorder %v1068_v7, 112  ;;  %vm331_vm14 = vcmp.lt.s32.totalorder %v1068_v7, 113  ;;  %vm359_vm15 = vcmp.lt.s32.totalorder %v1068_v7, 111  ;;  %v494_v7 = vld [vmem:[%s1271_s4] sm:$0xf] }
  0x3f   : > { %vm1079_vm4 = vcmp.ge.s32.totalorder %v246_v10, 1  ;;  %vm1094_vm10 = vcmp.lt.s32.totalorder %v246_v10, 15 }
  0x40   : > { %780 = vrot.lane.b32.xlu1 %v774_v2, %s903_s15  ;;  %770 = vrot.lane.b32.xlu0 %v774_v2, %s904_s16  ;;  %s699_s15 = sshll.u32 %s963_s22, 8  ;;  %s240_s16 = scalar_lea.vmem [#allocation5], %s686_s14 }
  0x41   : > { %s594_s22 = scalar_lea.sflag [#allocation4], %s1047_s13 }
  0x44   : > { %785 = vrot.lane.b32.xlu0 %v774_v2, %s905_s26  ;;  %790 = vrot.lane.b32.xlu1 %v774_v2, %s906_s29  ;;  %s608_s26 = sshll.u32 %s240_s16, 4  ;;  %s1224_s26 = int_to_ptr.vmem [resolvable:$true] %s608_s26 }
  0x45   : > { %s832_s7 = scalar_lea.vmem %s1224_s26, 256  ;;  %p839_p7 = scmp.lt.s32.totalorder %s1224_s26, %s837_s10 }
  0x46   : > { %p833_p6 = scmp.ne.s32.totalorder %s1224_s26, %s832_s7  ;;  %p840_p10 = scmp.lt.s32.totalorder %s838_s11, %s832_s7 }
  0x48   : > { %795 = vrot.lane.b32.xlu0 %v774_v2, %s907_s28  ;;  %355 = vrot.lane.b32.xlu1 %v1055_v0, %s908_s8  ;;  %p834_p12 = pnand %p833_p6, %p1297_p11  ;;  %p841_p2 = por %p840_p10, %p839_p7 }
  0x4a   : > { %p835_p13 = pneg %p834_p12 }
  0x4c   : > { %357 = vrot.lane.b32.xlu0 %v1059_v1, %s908_s8  ;;  %407 = vperm.xlu1 %799, %v404_v5   ;;  %s1222_s8 = scalar_lea.hbm %s1272_s5, %s699_s15  ;;  %p842_p4 = pnand %p841_p2, %p835_p13 }
  0x50   : > { %497 = vperm.xlu0 %800, %v494_v7  }
  0xae   : > { %v776_v11 = vpop.permute.xlu1 %775  ;;  %v766_v12 = vpop.permute.xlu0 %765 }
  0xaf   : > { %v778_v15 = vunpack.i.h.bf16 %v776_v11  ;;  %v777_v16 = vunpack.i.l.bf16 %v776_v11  ;;  %v768_v17 = vunpack.i.h.bf16 %v766_v12  ;;  %v767_v18 = vunpack.i.l.bf16 %v766_v12 }
  0xb1   : > { %v304_v21 = vsel %vm303_vm0, %v767_v18, %v768_v17  ;;  %v305_v22 = vsel %vm303_vm0, %v768_v17, %v767_v18  ;;  %v259_v23 = vsel %vm258_vm2, %v777_v16, %v778_v15  ;;  %v260_v24 = vsel %vm258_vm2, %v778_v15, %v777_v16  ;;  %vm1137_vm0 = vmand %vm247_vm6, %vm1089_vm8 }
  0xb2   : > { %v781_v26 = vpop.permute.xlu1 %780  ;;  %v771_v27 = vpop.permute.xlu0 %770  ;;  %v311_v28 = vsel %vm1079_vm4, %v304_v21, 0.0  ;;  %v310_v29 = vsel %vm1085_vm7, %v305_v22, 0.0  ;;  %v268_v34 = vsel %vm1079_vm4, %v259_v23, 0.0  ;;  %v267_v36 = vsel %vm1110_vm12, %v260_v24, 0.0  ;;  %vm1183_vm2 = vmand %vm326_vm9, %vm1094_vm10 }
  0xb3   : > { %v783_v30 = vunpack.i.h.bf16 %v781_v26  ;;  %v782_v31 = vunpack.i.l.bf16 %v781_v26  ;;  %v773_v32 = vunpack.i.h.bf16 %v771_v27  ;;  %v772_v33 = vunpack.i.l.bf16 %v771_v27 }
  0xb4   : > { %v379_v35 = vrot.slane %v311_v28, 4  ;;  %v378_v47 = vrot.slane %v310_v29, 4 }
  0xb5   : > { %v275_v37 = vsel %vm273_vm1, %v773_v32, %v772_v33  ;;  %v274_v38 = vsel %vm273_vm1, %v772_v33, %v773_v32  ;;  %v289_v39 = vsel %vm288_vm5, %v782_v31, %v783_v30  ;;  %v290_v40 = vsel %vm288_vm5, %v783_v30, %v782_v31  ;;  %vm1167_vm1 = vmand %vm326_vm9, %vm1079_vm4 }
  0xb6   : > { %v786_v42 = vpop.permute.xlu0 %785  ;;  %v791_v43 = vpop.permute.xlu1 %790  ;;  %v298_v44 = vsel %vm1094_vm10, %v289_v39, 0.0  ;;  %v373_v45 = vrot.slane %v274_v38, 4  ;;  %v280_v46 = vsel %vm247_vm6, %v275_v37, 0.0  ;;  %v297_v54 = vsel %vm1137_vm0, %v290_v40, 0.0  ;;  %v493_v37 = vld [vmem:[%s1270_s3] sm:$0xf] }
  0xb7   : > { %v788_v48 = vunpack.i.h.bf16 %v786_v42  ;;  %v787_v49 = vunpack.i.l.bf16 %v786_v42  ;;  %v793_v50 = vunpack.i.h.bf16 %v791_v43  ;;  %v792_v51 = vunpack.i.l.bf16 %v791_v43 }
  0xb8   : > { %v396_v52 = vsel %vm394_vm11, %v268_v34, %v373_v45  ;;  %v398_v53 = vsel %vm394_vm11, %v298_v44, %v379_v35  ;;  %v372_v55 = vrot.slane %v280_v46, 4  ;;  %v397_v15 = vsel %vm394_vm11, %v297_v54, %v378_v47 }
  0xb9   : > { %v317_v56 = vsel %vm316_vm3, %v787_v49, %v788_v48  ;;  %v318_v57 = vsel %vm316_vm3, %v788_v48, %v787_v49  ;;  %v347_v58 = vsel %vm346_vm13, %v792_v51, %v793_v50  ;;  %v348_v59 = vsel %vm346_vm13, %v793_v50, %v792_v51 }
  0xba   : > { %v323_v60 = vsel %vm1089_vm8, %v317_v56, 0.0  ;;  %v354_v61 = vsel %vm326_vm9, %v348_v59, 0.0  ;;  %v390_v62 = vrot.slane %v347_v58, 4  ;;  %v796_v63 = vpop.permute.xlu0 %795  ;;  %v324_v2 = vsel %vm1094_vm10, %v318_v57, 0.0  ;;  %v356_v16 = vpop.permute.xlu1 %355 }
  0xbb   : > { %v384_v3 = vrot.slane %v323_v60, 4  ;;  %v391_v4 = vrot.slane %v354_v61, 4  ;;  %v798_v5 = vunpack.i.h.bf16 %v796_v63  ;;  %v797_v6 = vunpack.i.l.bf16 %v796_v63 }
  0xbc   : > { %v385_v10 = vrot.slane %v324_v2, 4  ;;  %v700_v11 = vpack.c.bf16 %v398_v53, %v396_v52  ;;  %v395_v12 = vsel %vm394_vm11, %v267_v36, %v372_v55  ;;  %vm410_vm3 = vcmask 293888  }
  0xbd   : > { %v332_v17 = vsel %vm331_vm14, %v797_v6, %v798_v5  ;;  %v333_v18 = vsel %vm331_vm14, %v798_v5, %v797_v6  ;;  %v702_v13 = vpack.c.bf16 %v397_v15, %v395_v12  ;;  %v399_v25 = vsel %vm394_vm11, %v1055_v0, %v384_v3 }
  0xbe   : > { %701 = vmatprep.subr.bf16.mxu0 %v700_v11  ;;  %v341_v21 = vsel %vm1167_vm1, %v333_v18, 0.0  ;;  %v358_v23 = vpop.permute.xlu0 %357  ;;  %v340_v24 = vsel %vm1085_vm7, %v332_v17, 0.0  ;;  %v400_v26 = vsel %vm394_vm11, %v1059_v1, %v385_v10  ;;  %v403_v1 = vld [vmem:[%s1268_s1] sm:$0xf]  ;;  %vm500_vm4 = vcmask 31744  }
  0xbf   : > { %703 = vmatpush1.bf16.msra.mxu0 %v702_v13  ;;  %v402_v27 = vsel %vm394_vm11, %v341_v21, %v391_v4  ;;  %v361_v8 = vsel %vm359_vm15, %v358_v23, %v356_v16  ;;  %v401_v20 = vsel %vm394_vm11, %v340_v24, %v390_v62  ;;  %v360_v14 = vsel %vm359_vm15, %v356_v16, %v358_v23 }
  0xc0   : > { %v704_v28 = vpack.c.bf16 %v402_v27, %v400_v26  ;;  %v706_v29 = vpack.c.bf16 %v401_v20, %v399_v25  ;;  %v369_v30 = vsel %vm1183_vm2, %v361_v8, 0.0  ;;  %v368_v0 = vsel %vm1089_vm8, %v360_v14, 0.0 }
  0xc2   : > { %705 = vmatprep.subr.bf16.mxu0 %v704_v28 }
  0xc3   : > { %707 = vmatpush1.bf16.msra.mxu0 %v706_v29 }
  0xc4   : > { %687 = vmatprep.subr.msk.mxu0 %vm394_vm11, %v369_v30 }
  0xc7   : > { %688 = vmatpush1.msk.msra.mxu0 %vm394_vm11, %v368_v0 }
  0xc8   : > { %689 = vmatmul.mubr.msk.f32.vlgmr.msra.gmra.mrb[0].mxu0 %vm410_vm3, %v403_v1 }
  0xcb   : > { %v408_v31 = vpop.permute.xlu1 %407 }
  0xcf   : > { %v498_v38 = vpop.permute.xlu0 %497 }
 0x19b   : > { %v486_v32 = vpop.f32.mrb[0].mxu0 }
 0x19c   : > { %v487_v19 = vadd.f32 %v486_v32, %v408_v31  ;;  %v488_v33 = vpop.f32.mrb[1].mxu0 }
 0x19d   : > { %v489_v34 = vadd.f32 %v488_v33, %v408_v31 }
 0x19e   : > { %v491_v36 = vmax.f32 %v487_v19, 0.0 }
 0x19f   : > { %v492_v35 = vmax.f32 %v489_v34, 0.0 }
 0x1a1   : > { %690 = vmatprep.subr.msk.mxu1 %vm394_vm11, %v492_v35 }
 0x1a2   : > { %691 = vmatpush1.msk.msra.mxu1 %vm394_vm11, %v491_v36 }
 0x1a3   : > { %692 = vmatmul.mubr.msk.f32.vlgmr.msra.gmra.mrb[0].mxu1 %vm500_vm4, %v493_v37 }
 0x276   : > { %v576_v39 = vpop.f32.mrb[0].mxu1 }
 0x277   : > { %v577_v40 = vadd.f32 %v576_v39, %v498_v38  ;;  %v578_v41 = vpop.f32.mrb[1].mxu1 }
 0x278   : > { %v579_v42 = vadd.f32 %v578_v41, %v498_v38 }
 0x279   : > { %v581_v43 = vmax.f32 %v577_v40, 0.0 }
 0x27a   : > { %v582_v44 = vmax.f32 %v579_v42, 0.0 }
 0x27b   : > { %v585_v45 = vrot.slane %v581_v43, 4 }
 0x27c   : > { %v586_v46 = vrot.slane %v582_v44, 4 }
 0x27d   : > { %v589_v47 = vsel %vm394_vm11, %v491_v36, %v585_v45 }
 0x27e   : > { %591 = vst [vmem:[%s240_s16] sm:$0xff] %v589_v47  ;;  %v590_v48 = vsel %vm394_vm11, %v492_v35, %v586_v46 }
 0x27f   : > { %592 = vst [vmem:[%s240_s16 + $0x8] sm:$0xff] %v590_v48 }
 0x280   : > { %845 = shalt.err (!%p842_p4)
}
 0x281   : > { %s846_s13 = scalar_lea.hbm %s1222_s8, 256  ;;  %s850_s25 = scalar_lea.hbm %s1272_s5, 512 }
 0x282   : > { %p847_p5 = scmp.ne.s32.totalorder %s1222_s8, %s846_s13  ;;  %p851_p0 = scmp.lt.u32.totalorder %s1222_s8, %s1272_s5 }
 0x283   : > { %p852_p1 = scmp.lt.u32.totalorder %s850_s25, %s846_s13  ;;  %p854_p6 = scmp.lt.u32.totalorder %s846_s13, %s1222_s8 }
 0x284   : > { %p848_p8 = pnand %p847_p5, %p1297_p11 }
 0x285   : > { %p853_p3 = por %p852_p1, %p851_p0 }
 0x286   : > { %p849_p9 = pneg %p848_p8 }
 0x287   : > { %p855_p12 = por %p854_p6, %p853_p3 }
 0x289   : > { %p856_p13 = pnand %p855_p12, %p849_p9 }
 0x28b   : > { %859 = shalt.err (!%p856_p13)
}
 0x28c   : > { %710 = dma.vmem_to_hbm [thread:$0]  (%p1297_p11), %s1224_s26, 256, %s1222_s8, %s594_s22  }
 0x28d PF: > { %s620_s15 = sand.u32 1, %s886_s18   ;;  %p1298_p7 = scmp.ne.s32.totalorder %s1277_s6, 0 }
 0x28e   : > { %p1299_p10 = scmp.ge.s32.totalorder %s898_s21, 2  ;;  %s621_s16 = scalar_lea.sflag [#allocation4], %s620_s15 }
 0x290   : > { %p717_p2 = pnand %p1299_p10, %p1298_p7 }
 0x292   : > { %881 = dma.done.wait (!%p717_p2), %s621_s16, 256  }
 0x293   : > { %883 = vsyncadd (!%p717_p2), %s621_s16, 4294967040  ;;  %p18_p4 = scmp.ge.s32.totalorder %s967_s24, 4   ;;  %s1300_s18 = smov %s890_s19 }
 0x294   : > { %s1301_s19 = smov %s894_s20  ;;  %s1302_s20 = smov %s979_s27 }
 0x295   : > { %s1303_s21 = smov %s967_s24  ;;  %20 = sbr.rel (!%p18_p4) target bundleno = 5 (0x5), region = 85 }
 0x29c   :  { %626 = vsyncpa [#allocation3], 1 }
 0x29d   :  { %628 = vsyncpa [#allocation3 + $0x1], 1 }
 0x29e   :  { %629 = vsyncpa [#allocation4], 1 }
 0x29f   :  { %631 = vsyncpa [#allocation4 + $0x1], 1 }

</bundles_post_ra>
